<compile_context>
chip_gen: v5e
topology: v5e:2x2
jax: 0.10.0
libtpu: 0.0.40
codegen_flags: <defaults>
</compile_context>

<pallas_src>
import jax
import jax.numpy as jnp
from jax.experimental import pallas as pl
from jax.experimental.pallas import tpu as pltpu


def _round_up(n, m):
    return ((n + m - 1) // m) * m


def mlp_kernel(x_ref, w1_ref, b1_ref, w2_ref, b2_ref, o_ref):
    # x_ref : (TB, 64)   bf16  streamed batch tile (double-buffered)
    # w1_ref: (64, 32)   f32   fc1 weight (in, out), VMEM-resident
    # b1_ref: (1, 32)    f32
    # w2_ref: (32, 1)    f32   fc2 weight as a column
    # b2_ref: (1, 1)     f32   SMEM scalar
    # o_ref : (1, 1, TB) f32   lane-dense output row
    x = x_ref[...].astype(jnp.float32)           # bf16 HBM stream -> f32 compute

    # fc1 + ReLU (MXU matmul, f32 accumulate)
    h = jnp.dot(x, w1_ref[...], preferred_element_type=jnp.float32) + b1_ref[...]
    h = jnp.maximum(h, 0.0)                      # (TB, 32)

    # Put batch rows on the lane axis (single XLU transpose, hidden under DMA),
    # then fc2 (out_features = 1) is a VPU multiply + 32-deep sublane reduce —
    # no degenerate N=1 MXU pass, and the output store is lane-dense.
    ht = h.T                                     # (32, TB)
    y = jnp.sum(ht * w2_ref[...], axis=0, keepdims=True) + b2_ref[0, 0]  # (1, TB)

    # Exact sigmoid (EUP/VALU have slack in this HBM-bound kernel).
    y = 1.0 / (1.0 + jnp.exp(-y))

    o_ref[0] = y.astype(o_ref.dtype)             # (1, TB) lane-dense store


def mlp_forward(x, w1, b1, w2, b2, *, block_rows=2048):
    """x: (B, 64) f32.  w1: (64,32), b1: (32,), w2: (32,1), b2: (1,).  Returns (B,1) f32."""
    B, D_IN = x.shape
    D_HID = b1.shape[0]

    # Row tile: multiple of 128 (lane-dense output / bf16 sublane packing),
    # capped at the 128-rounded batch (single-tile case uses the full array).
    TB = max(128, _round_up(block_rows, 128))
    TB = min(TB, _round_up(B, 128))

    grid_len = pl.cdiv(B, TB)
    # v7x has 2 TensorCores; an even grid splits the "parallel" batch axis
    # evenly (at most one extra padded tile). No effect on v5e/v6e (1 TC).
    if grid_len > 1 and grid_len % 2 == 1:
        grid_len += 1
    Bp = grid_len * TB

    if Bp != B:
        x = jnp.pad(x, ((0, Bp - B), (0, 0)))
    x_lp = x.astype(jnp.bfloat16)                # halve HBM bytes on the x stream

    b1_row = b1.reshape(1, D_HID).astype(jnp.float32)   # (1, 32)
    w2_col = w2.reshape(D_HID, 1).astype(jnp.float32)   # (32, 1)
    b2_2d = b2.reshape(1, 1).astype(jnp.float32)        # (1, 1) -> SMEM scalar

    weight_bytes = (D_IN * D_HID + D_HID + D_HID + 1) * 4
    cost = pl.CostEstimate(
        flops=2 * Bp * D_IN * D_HID + 2 * Bp * D_HID,
        transcendentals=Bp,
        bytes_accessed=Bp * D_IN * 2 + Bp * 4 + weight_bytes,
    )

    out_p = pl.pallas_call(
        mlp_kernel,
        out_shape=jax.ShapeDtypeStruct((grid_len, 1, TB), jnp.float32),
        grid=(grid_len,),
        in_specs=[
            # Streamed, double-buffered batch tiles of x.
            pl.BlockSpec((TB, D_IN), lambda i: (i, 0)),
            # Weights / biases: constant index_map -> stay resident in VMEM.
            pl.BlockSpec((D_IN, D_HID), lambda i: (0, 0)),
            pl.BlockSpec((1, D_HID), lambda i: (0, 0)),
            pl.BlockSpec((D_HID, 1), lambda i: (0, 0)),
            # b2 as an SMEM scalar (no padded VMEM tile / DMA).
            pl.BlockSpec(memory_space=pltpu.MemorySpace.SMEM),
        ],
        # Lane-dense output block: one (1, TB) row per grid step.
        out_specs=pl.BlockSpec((1, 1, TB), lambda i: (i, 0, 0)),
        compiler_params=pltpu.CompilerParams(
            dimension_semantics=("parallel",),
        ),
        cost_estimate=cost,
    )(x_lp, w1, b1_row, w2_col, b2_2d)

    # (grid_len, 1, TB) row-major == batch order; reshape back and drop padding.
    return out_p.reshape(Bp, 1)[:B]


def init_params(key):
    """Deterministic init mimicking nn.Linear's U(-1/sqrt(fan_in), 1/sqrt(fan_in))."""
    k1, k2, k3, k4 = jax.random.split(key, 4)
    bound1 = 1.0 / jnp.sqrt(64.0)
    bound2 = 1.0 / jnp.sqrt(32.0)
    # Stored as (in_features, out_features), i.e. already transposed vs torch.
    w1 = jax.random.uniform(k1, (64, 32), jnp.float32, -bound1, bound1)
    b1 = jax.random.uniform(k2, (32,), jnp.float32, -bound1, bound1)
    w2 = jax.random.uniform(k3, (32, 1), jnp.float32, -bound2, bound2)
    b2 = jax.random.uniform(k4, (1,), jnp.float32, -bound2, bound2)
    return w1, b1, w2, b2


if __name__ == "__main__":
    key = jax.random.PRNGKey(0)
    k_x, k_p = jax.random.split(key)

    # Small but non-trivial batch: not a multiple of the tile, so padding is
    # exercised; features match the module (Linear(64 -> 32) -> Linear(32 -> 1)).
    B = 300
    x = jax.random.normal(k_x, (B, 64), jnp.float32)
    w1, b1, w2, b2 = init_params(k_p)

    # Reference in plain JAX (same math as the PyTorch forward, f32 throughout).
    h_ref = jnp.maximum(x @ w1 + b1, 0.0)
    y_ref = jax.nn.sigmoid(h_ref @ w2 + b2)

    # 1) Default tile: single-tile path (TB = round_up(B, 128)).
    out = jax.block_until_ready(mlp_forward(x, w1, b1, w2, b2))
    assert out.shape == (B, 1)
    # Tolerance covers the bf16 streaming of x (~1e-3 on pre-sigmoid logits).
    assert jnp.allclose(out, y_ref, atol=2e-3, rtol=2e-3), float(
        jnp.max(jnp.abs(out - y_ref))
    )

    # 2) Small tile: multi-step grid + even-grid padding path (TB=128, grid=(4,)).
    out_small = jax.block_until_ready(mlp_forward(x, w1, b1, w2, b2, block_rows=128))
    assert out_small.shape == (B, 1)
    assert jnp.allclose(out_small, y_ref, atol=2e-3, rtol=2e-3), float(
        jnp.max(jnp.abs(out_small - y_ref))
    )

    print("KERNEL_OK")
</pallas_src>

<mosaic_0001>
module attributes {stable_mosaic.version = 11 : i64} {
  func.func @mlp_kernel(%arg0: i32, %arg1: memref<384x64xbf16, #tpu.memory_space<vmem>>, %arg2: memref<64x32xf32, #tpu.memory_space<vmem>>, %arg3: memref<1x32xf32, #tpu.memory_space<vmem>>, %arg4: memref<32x1xf32, #tpu.memory_space<vmem>>, %arg5: memref<1x1xf32, #tpu.memory_space<smem>>, %arg6: memref<1x1x384xf32, #tpu.memory_space<vmem>>) attributes {dimension_semantics = [#tpu.dimension_semantics<parallel>], iteration_bounds = array<i64: 1>, scalar_prefetch = 0 : i64, scratch_operands = 0 : i64, tpu.core_type = #tpu.core_type<tc>, window_params = [{transform_indices = @transform_0, window_bounds = array<i64: 384, 64>}, {pipeline_mode = #tpu.pipeline_mode<synchronous>, transform_indices = @transform_1, window_bounds = array<i64: 64, 32>}, {pipeline_mode = #tpu.pipeline_mode<synchronous>, transform_indices = @transform_2, window_bounds = array<i64: 1, 32>}, {pipeline_mode = #tpu.pipeline_mode<synchronous>, transform_indices = @transform_3, window_bounds = array<i64: 32, 1>}, {transform_indices = @transform_4, window_bounds = array<i64: 1, 1>}, {transform_indices = @transform_5, window_bounds = array<i64: 1, 1, 384>}]} {
    %c0 = arith.constant 0 : index
    %c0_0 = arith.constant 0 : index
    %0 = vector.load %arg1[%c0, %c0_0] : memref<384x64xbf16, #tpu.memory_space<vmem>>, vector<384x64xbf16>
    %1 = arith.extf %0 : vector<384x64xbf16> to vector<384x64xf32>
    %c0_1 = arith.constant 0 : index
    %c0_2 = arith.constant 0 : index
    %2 = vector.load %arg2[%c0_1, %c0_2] : memref<64x32xf32, #tpu.memory_space<vmem>>, vector<64x32xf32>
    %cst = arith.constant dense<0.000000e+00> : vector<384x32xf32>
    %3 = tpu.matmul %1, %2, %cst {dimension_numbers = #tpu.dot_dimension_numbers<[1], [0], [0], [1], [0, 0, 1, 1], [], []>} : vector<384x64xf32>, vector<64x32xf32>, vector<384x32xf32> -> vector<384x32xf32>
    %c0_3 = arith.constant 0 : index
    %c0_4 = arith.constant 0 : index
    %4 = vector.load %arg3[%c0_3, %c0_4] : memref<1x32xf32, #tpu.memory_space<vmem>>, vector<1x32xf32>
    %5 = vector.broadcast %4 : vector<1x32xf32> to vector<384x32xf32>
    %6 = arith.addf %3, %5 : vector<384x32xf32>
    %cst_5 = arith.constant 0.000000e+00 : f32
    %7 = vector.broadcast %cst_5 : f32 to vector<384x32xf32>
    %8 = arith.maximumf %6, %7 : vector<384x32xf32>
    %9 = tpu.transpose %8, [1, 0] : vector<384x32xf32> -> vector<32x384xf32>
    %c0_6 = arith.constant 0 : index
    %c0_7 = arith.constant 0 : index
    %10 = vector.load %arg4[%c0_6, %c0_7] : memref<32x1xf32, #tpu.memory_space<vmem>>, vector<32x1xf32>
    %11 = vector.broadcast %10 : vector<32x1xf32> to vector<32x384xf32>
    %12 = arith.mulf %9, %11 : vector<32x384xf32>
    %cst_8 = arith.constant dense<0.000000e+00> : vector<384xf32>
    %13 = vector.multi_reduction <add>, %12, %cst_8 [0] : vector<32x384xf32> to vector<384xf32>
    %14 = vector.shape_cast %13 : vector<384xf32> to vector<1x384xf32>
    %c0_9 = arith.constant 0 : index
    %c0_10 = arith.constant 0 : index
    %15 = memref.load %arg5[%c0_9, %c0_10] : memref<1x1xf32, #tpu.memory_space<smem>>
    %16 = vector.broadcast %15 : f32 to vector<1x384xf32>
    %17 = arith.addf %14, %16 : vector<1x384xf32>
    %cst_11 = arith.constant 0.000000e+00 : f32
    %18 = vector.broadcast %cst_11 : f32 to vector<1x384xf32>
    %19 = arith.subf %18, %17 : vector<1x384xf32>
    %20 = math.exp %19 : vector<1x384xf32>
    %cst_12 = arith.constant 1.000000e+00 : f32
    %21 = vector.broadcast %cst_12 : f32 to vector<1x384xf32>
    %22 = arith.addf %21, %20 : vector<1x384xf32>
    %cst_13 = arith.constant 1.000000e+00 : f32
    %23 = vector.broadcast %cst_13 : f32 to vector<1x384xf32>
    %24 = arith.divf %23, %22 : vector<1x384xf32>
    %c0_14 = arith.constant 0 : index
    %c0_15 = arith.constant 0 : index
    %c0_16 = arith.constant 0 : index
    %25 = vector.load %arg6[%c0_14, %c0_15, %c0_16] : memref<1x1x384xf32, #tpu.memory_space<vmem>>, vector<1x1x384xf32>
    %26 = vector.shape_cast %25 : vector<1x1x384xf32> to vector<1x384xf32>
    %27 = vector.shape_cast %24 : vector<1x384xf32> to vector<1x1x384xf32>
    tpu.vector_store %arg6[%c0_14, %c0_15, %c0_16], %27 {strides = array<i32>} : memref<1x1x384xf32, #tpu.memory_space<vmem>>, vector<1x1x384xf32>,
    return
  }
  func.func @transform_0(%arg0: i32) -> (i32, i32) {
    %c0_i32 = arith.constant 0 : i32
    %c0_i32_0 = arith.constant 0 : i32
    return %arg0, %c0_i32 : i32, i32
  }
  func.func @transform_1(%arg0: i32) -> (i32, i32) {
    %c0_i32 = arith.constant 0 : i32
    %c0_i32_0 = arith.constant 0 : i32
    %c0_i32_1 = arith.constant 0 : i32
    return %c0_i32, %c0_i32_0 : i32, i32
  }
  func.func @transform_2(%arg0: i32) -> (i32, i32) {
    %c0_i32 = arith.constant 0 : i32
    %c0_i32_0 = arith.constant 0 : i32
    %c0_i32_1 = arith.constant 0 : i32
    return %c0_i32, %c0_i32_0 : i32, i32
  }
  func.func @transform_3(%arg0: i32) -> (i32, i32) {
    %c0_i32 = arith.constant 0 : i32
    %c0_i32_0 = arith.constant 0 : i32
    %c0_i32_1 = arith.constant 0 : i32
    return %c0_i32, %c0_i32_0 : i32, i32
  }
  func.func @transform_4(%arg0: i32) -> (i32, i32) {
    %c0_i32 = arith.constant 0 : i32
    %c0_i32_0 = arith.constant 0 : i32
    %c0_i32_1 = arith.constant 0 : i32
    return %c0_i32, %c0_i32_0 : i32, i32
  }
  func.func @transform_5(%arg0: i32) -> (i32, i32, i32) {
    %c0_i32 = arith.constant 0 : i32
    %c0_i32_0 = arith.constant 0 : i32
    %c0_i32_1 = arith.constant 0 : i32
    return %arg0, %c0_i32, %c0_i32_0 : i32, i32, i32
  }
}

</mosaic_0001>

<bundles_post_ra>
// kernel: tpu_custom_call.1
= control target key start
LH: loop header
LB: loop body
LE: loop exit
PB: predicated region body
PF: predicated region fallthrough
CT: control target
= control target key end

     0   :  { %s1266_s0 = inlined_call_operand.vmem [shape: bf16[384,64], index: 0, kind: input, shape index: {}]   ;;  %s1267_s1 = inlined_call_operand.vmem [shape: f32[64,32], index: 1, kind: input, shape index: {}]   ;;  %s1268_s2 = inlined_call_operand.vmem [shape: f32[1,32], index: 2, kind: input, shape index: {}]   ;;  %s1269_s3 = inlined_call_operand.vmem [shape: f32[32,1], index: 3, kind: input, shape index: {}]   ;;  %s1270_s4 = inlined_call_operand.<no memory space> [shape: f32[1,1], index: 4, kind: input, shape index: {}]   ;;  %s1271_s5 = inlined_call_operand.hbm [shape: f32[1,1,384], index: 5, kind: output, shape index: {}]  }
   0x1   :  { %v125_v0 = vld [vmem:[%s1267_s1 + $0x38] sm:$0xff]  ;;  %v124_v1 = vld [vmem:[%s1267_s1 + $0x30] sm:$0xff]  ;;  %v123_v2 = vld [vmem:[%s1267_s1 + $0x28] sm:$0xff] }
   0x2   :  { %283 = vmatpush.msra.mxu0 %v125_v0  ;;  %903 = vmatpush.msra.mxu1 %v125_v0  ;;  %v122_v3 = vld [vmem:[%s1267_s1 + $0x20] sm:$0xff] }
   0x3   :  { %904 = vmatpush.msra.mxu2 %v125_v0  ;;  %905 = vmatpush.msra.mxu3 %v125_v0 }
   0x4   :  { %284 = vmatpush.msra.mxu0 %v124_v1  ;;  %906 = vmatpush.msra.mxu1 %v124_v1 }
   0x5   :  { %907 = vmatpush.msra.mxu2 %v124_v1  ;;  %908 = vmatpush.msra.mxu3 %v124_v1 }
   0x6   :  { %285 = vmatpush.msra.mxu0 %v123_v2  ;;  %909 = vmatpush.msra.mxu1 %v123_v2 }
   0x7   :  { %11 = vsyncpa [#allocation4], 0  ;;  %910 = vmatpush.msra.mxu2 %v123_v2  ;;  %v121_v4 = vld [vmem:[%s1267_s1 + $0x18] sm:$0xff]  ;;  %911 = vmatpush.msra.mxu3 %v123_v2  ;;  %v120_v5 = vld [vmem:[%s1267_s1 + $0x10] sm:$0xff]  ;;  %vm130_vm0 = vcmask 523264   ;;  %v971_v50 = vmov 0  }
   0x8   :  { %286 = vmatpush.msra.mxu0 %v122_v3  ;;  %912 = vmatpush.msra.mxu1 %v122_v3  ;;  %v785_v6 = vld [vmem:[%s1266_s0] sm:$0xff]   ;;  %v119_v7 = vld [vmem:[%s1267_s1 + $0x8] sm:$0xff]  ;;  %v885_v8 = vld [vmem:[%s1266_s0 + $0x30] sm:$0xff]   ;;  %vm710_vm7 = vcmask 1040384   ;;  %s727_s16 = sshll.u32 %s1271_s5, 4  ;;  %vm712_vm14 = vcmask 1041408   ;;  %s728_s16 = int_to_ptr.hbm [resolvable:$true] %s727_s16 }
   0x9   :  { %913 = vmatpush.msra.mxu2 %v122_v3  ;;  %914 = vmatpush.msra.mxu3 %v122_v3  ;;  %v891_v9 = vld [vmem:[%s1266_s0 + $0x60] sm:$0xff]   ;;  %v786_v11 = vunpack.c.l.bf16 %v785_v6  ;;  %v810_v12 = vunpack.c.l.bf16 %v885_v8  ;;  %v787_v14 = vunpack.c.h.bf16 %v785_v6  ;;  %v811_v15 = vunpack.c.h.bf16 %v885_v8  ;;  %v880_v17 = vld [vmem:[%s1266_s0 + $0x8] sm:$0xff]   ;;  %v886_v18 = vld [vmem:[%s1266_s0 + $0x38] sm:$0xff]  }
   0xa   :  { %287 = vmatpush.msra.mxu0 %v121_v4  ;;  %915 = vmatpush.msra.mxu1 %v121_v4  ;;  %v118_v10 = vld [vmem:[%s1267_s1] sm:$0xff]  ;;  %v834_v13 = vunpack.c.l.bf16 %v891_v9  ;;  %v835_v16 = vunpack.c.h.bf16 %v891_v9  ;;  %v892_v19 = vld [vmem:[%s1266_s0 + $0x68] sm:$0xff]   ;;  %v790_v20 = vunpack.c.l.bf16 %v880_v17  ;;  %v814_v21 = vunpack.c.l.bf16 %v886_v18  ;;  %v881_v26 = vld [vmem:[%s1266_s0 + $0x10] sm:$0xff]  }
   0xb   :  { %916 = vmatpush.msra.mxu2 %v121_v4  ;;  %917 = vmatpush.msra.mxu3 %v121_v4  ;;  %v838_v22 = vunpack.c.l.bf16 %v892_v19  ;;  %v791_v23 = vunpack.c.h.bf16 %v880_v17  ;;  %v815_v24 = vunpack.c.h.bf16 %v886_v18  ;;  %v839_v25 = vunpack.c.h.bf16 %v892_v19  ;;  %v887_v27 = vld [vmem:[%s1266_s0 + $0x40] sm:$0xff]   ;;  %v893_v28 = vld [vmem:[%s1266_s0 + $0x70] sm:$0xff]   ;;  %v882_v35 = vld [vmem:[%s1266_s0 + $0x18] sm:$0xff]  }
   0xc   :  { %288 = vmatpush.msra.mxu0 %v120_v5  ;;  %918 = vmatpush.msra.mxu1 %v120_v5  ;;  %v794_v29 = vunpack.c.l.bf16 %v881_v26  ;;  %v818_v30 = vunpack.c.l.bf16 %v887_v27  ;;  %v842_v31 = vunpack.c.l.bf16 %v893_v28  ;;  %v795_v32 = vunpack.c.h.bf16 %v881_v26  ;;  %v888_v36 = vld [vmem:[%s1266_s0 + $0x48] sm:$0xff]   ;;  %v894_v37 = vld [vmem:[%s1266_s0 + $0x78] sm:$0xff]   ;;  %v883_v44 = vld [vmem:[%s1266_s0 + $0x20] sm:$0xff]  }
   0xd   :  { %919 = vmatpush.msra.mxu2 %v120_v5  ;;  %920 = vmatpush.msra.mxu3 %v120_v5  ;;  %v819_v33 = vunpack.c.h.bf16 %v887_v27  ;;  %v843_v34 = vunpack.c.h.bf16 %v893_v28  ;;  %v798_v38 = vunpack.c.l.bf16 %v882_v35  ;;  %v822_v39 = vunpack.c.l.bf16 %v888_v36  ;;  %v580_v45 = vld [vmem:[%s1269_s3] sm:$0xff]  ;;  %v897_v46 = vld [vmem:[%s1266_s0 + $0x90] sm:$0xff]   ;;  %v581_v47 = vld [vmem:[%s1269_s3 + $0x8] sm:$0xff] }
   0xe   :  { %289 = vmatpush.msra.mxu0 %v119_v7  ;;  %921 = vmatpush.msra.mxu1 %v119_v7  ;;  %v846_v40 = vunpack.c.l.bf16 %v894_v37  ;;  %v799_v41 = vunpack.c.h.bf16 %v882_v35  ;;  %v823_v42 = vunpack.c.h.bf16 %v888_v36  ;;  %v847_v43 = vunpack.c.h.bf16 %v894_v37  ;;  %v889_v48 = vld [vmem:[%s1266_s0 + $0x50] sm:$0xff]   ;;  %v895_v49 = vld [vmem:[%s1266_s0 + $0x80] sm:$0xff]   ;;  %v898_v59 = vld [vmem:[%s1266_s0 + $0x98] sm:$0xff]  }
   0xf   :  { %922 = vmatpush.msra.mxu2 %v119_v7  ;;  %923 = vmatpush.msra.mxu3 %v119_v7  ;;  %v858_v51 = vunpack.c.l.bf16 %v897_v46  ;;  %v802_v52 = vunpack.c.l.bf16 %v883_v44  ;;  %v826_v53 = vunpack.c.l.bf16 %v889_v48  ;;  %v850_v54 = vunpack.c.l.bf16 %v895_v49  ;;  %v884_v61 = vld [vmem:[%s1266_s0 + $0x28] sm:$0xff]   ;;  %v890_v62 = vld [vmem:[%s1266_s0 + $0x58] sm:$0xff]   ;;  %v899_v7 = vld [vmem:[%s1266_s0 + $0xa0] sm:$0xff]  }
  0x10   :  { %290 = vmatpush.msra.mxu0 %v118_v10  ;;  %924 = vmatpush.msra.mxu1 %v118_v10  ;;  %v859_v55 = vunpack.c.h.bf16 %v897_v46  ;;  %v803_v56 = vunpack.c.h.bf16 %v883_v44  ;;  %v827_v57 = vunpack.c.h.bf16 %v889_v48  ;;  %v851_v58 = vunpack.c.h.bf16 %v895_v49  ;;  %v896_v63 = vld [vmem:[%s1266_s0 + $0x88] sm:$0xff]   ;;  %v901_v17 = vld [vmem:[%s1266_s0 + $0xb0] sm:$0xff]  }
  0x11   :  { %925 = vmatpush.msra.mxu2 %v118_v10  ;;  %736 = vmatmul.msk.f32.vlgmr.msra.gmra.mxu0 %vm130_vm0, %v786_v11  ;;  %v862_v60 = vunpack.c.l.bf16 %v898_v59  ;;  %v806_v0 = vunpack.c.l.bf16 %v884_v61  ;;  %v830_v1 = vunpack.c.l.bf16 %v890_v62  ;;  %v854_v2 = vunpack.c.l.bf16 %v896_v63 }
  0x12   :  { %748 = vmatmul.msk.f32.vlgmr.msra.gmra.mxu1 %vm130_vm0, %v810_v12  ;;  %760 = vmatmul.msk.f32.vlgmr.msra.gmra.mxu2 %vm130_vm0, %v834_v13  ;;  %v863_v3 = vunpack.c.h.bf16 %v898_v59  ;;  %v807_v4 = vunpack.c.h.bf16 %v884_v61  ;;  %v831_v5 = vunpack.c.h.bf16 %v890_v62  ;;  %v855_v6 = vunpack.c.h.bf16 %v896_v63  ;;  %v1148_v13 = vld [vmem:[%s1268_s2] ss:$0 sm:$0xff] }
  0x13   :  { %926 = vmatpush.msra.mxu3 %v118_v10  ;;  %929 = vset.pattern.permute.xlu0 %v971_v50  ;;  %v866_v8 = vunpack.c.l.bf16 %v899_v7  ;;  %v867_v9 = vunpack.c.h.bf16 %v899_v7  ;;  %v900_v10 = vld [vmem:[%s1266_s0 + $0xa8] sm:$0xff]   ;;  %v874_v18 = vunpack.c.l.bf16 %v901_v17 }
  0x14   :  { %930 = vset.pattern.permute.xlu1 %v971_v50  ;;  %586 = vperm.xlu0 %929, %v580_v45   ;;  %v870_v11 = vunpack.c.l.bf16 %v900_v10  ;;  %v871_v12 = vunpack.c.h.bf16 %v900_v10 }
  0x15   :  { %591 = vperm.xlu1 %930, %v581_v47   ;;  %772 = vmatmul.msk.f32.vlgmr.msra.gmra.mxu3 %vm130_vm0, %v858_v51 }
  0x19   :  { %737 = vmatmul.msk.f32.gmra.mxu0 %vm130_vm0, %v787_v14 }
  0x1a   :  { %749 = vmatmul.msk.f32.gmra.mxu1 %vm130_vm0, %v811_v15  ;;  %761 = vmatmul.msk.f32.gmra.mxu2 %vm130_vm0, %v835_v16 }
  0x1d   :  { %773 = vmatmul.msk.f32.gmra.mxu3 %vm130_vm0, %v859_v55 }
  0x21   :  { %738 = vmatmul.msk.f32.gmra.mxu0 %vm130_vm0, %v790_v20 }
  0x22   :  { %750 = vmatmul.msk.f32.gmra.mxu1 %vm130_vm0, %v814_v21  ;;  %762 = vmatmul.msk.f32.gmra.mxu2 %vm130_vm0, %v838_v22 }
  0x25   :  { %774 = vmatmul.msk.f32.gmra.mxu3 %vm130_vm0, %v862_v60 }
  0x29   :  { %739 = vmatmul.msk.f32.gmra.mxu0 %vm130_vm0, %v791_v23 }
  0x2a   :  { %751 = vmatmul.msk.f32.gmra.mxu1 %vm130_vm0, %v815_v24  ;;  %763 = vmatmul.msk.f32.gmra.mxu2 %vm130_vm0, %v839_v25  ;;  %v875_v24 = vunpack.c.h.bf16 %v901_v17 }
  0x2d   :  { %775 = vmatmul.msk.f32.gmra.mxu3 %vm130_vm0, %v863_v3 }
  0x31   :  { %740 = vmatmul.msk.f32.gmra.mxu0 %vm130_vm0, %v794_v29 }
  0x32   :  { %752 = vmatmul.msk.f32.gmra.mxu1 %vm130_vm0, %v818_v30  ;;  %764 = vmatmul.msk.f32.gmra.mxu2 %vm130_vm0, %v842_v31  ;;  %v902_v30 = vld [vmem:[%s1266_s0 + $0xb8] sm:$0xff]  }
  0x33   :  { %v878_v31 = vunpack.c.l.bf16 %v902_v30  ;;  %v879_v37 = vunpack.c.h.bf16 %v902_v30 }
  0x35   :  { %776 = vmatmul.msk.f32.gmra.mxu3 %vm130_vm0, %v866_v8 }
  0x39   :  { %741 = vmatmul.msk.f32.gmra.mxu0 %vm130_vm0, %v795_v32 }
  0x3a   :  { %753 = vmatmul.msk.f32.gmra.mxu1 %vm130_vm0, %v819_v33  ;;  %765 = vmatmul.msk.f32.gmra.mxu2 %vm130_vm0, %v843_v34 }
  0x3d   :  { %777 = vmatmul.msk.f32.gmra.mxu3 %vm130_vm0, %v867_v9 }
  0x41   :  { %742 = vmatmul.msk.f32.gmra.mxu0 %vm130_vm0, %v798_v38 }
  0x42   :  { %754 = vmatmul.msk.f32.gmra.mxu1 %vm130_vm0, %v822_v39  ;;  %766 = vmatmul.msk.f32.gmra.mxu2 %vm130_vm0, %v846_v40 }
  0x45   :  { %778 = vmatmul.msk.f32.gmra.mxu3 %vm130_vm0, %v870_v11 }
  0x49   :  { %743 = vmatmul.msk.f32.gmra.mxu0 %vm130_vm0, %v799_v41 }
  0x4a   :  { %755 = vmatmul.msk.f32.gmra.mxu1 %vm130_vm0, %v823_v42  ;;  %767 = vmatmul.msk.f32.gmra.mxu2 %vm130_vm0, %v847_v43 }
  0x4d   :  { %779 = vmatmul.msk.f32.gmra.mxu3 %vm130_vm0, %v871_v12 }
  0x51   :  { %744 = vmatmul.msk.f32.gmra.mxu0 %vm130_vm0, %v802_v52 }
  0x52   :  { %756 = vmatmul.msk.f32.gmra.mxu1 %vm130_vm0, %v826_v53  ;;  %768 = vmatmul.msk.f32.gmra.mxu2 %vm130_vm0, %v850_v54 }
  0x55   :  { %780 = vmatmul.msk.f32.gmra.mxu3 %vm130_vm0, %v874_v18 }
  0x59   :  { %745 = vmatmul.msk.f32.gmra.mxu0 %vm130_vm0, %v803_v56 }
  0x5a   :  { %757 = vmatmul.msk.f32.gmra.mxu1 %vm130_vm0, %v827_v57  ;;  %769 = vmatmul.msk.f32.gmra.mxu2 %vm130_vm0, %v851_v58 }
  0x5d   :  { %781 = vmatmul.msk.f32.gmra.mxu3 %vm130_vm0, %v875_v24 }
  0x61   :  { %746 = vmatmul.msk.f32.gmra.mxu0 %vm130_vm0, %v806_v0 }
  0x62   :  { %758 = vmatmul.msk.f32.gmra.mxu1 %vm130_vm0, %v830_v1  ;;  %770 = vmatmul.msk.f32.gmra.mxu2 %vm130_vm0, %v854_v2 }
  0x65   :  { %782 = vmatmul.msk.f32.gmra.mxu3 %vm130_vm0, %v878_v31 }
  0x69   :  { %747 = vmatmul.msk.f32.gmra.mxu0 %vm130_vm0, %v807_v4 }
  0x6a   :  { %759 = vmatmul.msk.f32.gmra.mxu1 %vm130_vm0, %v831_v5  ;;  %771 = vmatmul.msk.f32.gmra.mxu2 %vm130_vm0, %v855_v6 }
  0x6d   :  { %783 = vmatmul.msk.f32.gmra.mxu3 %vm130_vm0, %v879_v37 }
  0x8e   :  { %v292_v14 = vpop.f32.mrf.mxu0 }
  0x8f   :  { %v293_v15 = vadd.f32 %v1148_v13, %v292_v14  ;;  %v1151_v16 = vpop.f32.mrf.mxu1 }
  0x91   :  { %v436_v19 = vmax.f32 %v293_v15, 0.0 }
  0x93   :  { %484 = vxpose.xlu0.b32.start [1/16] (narrow) %v436_v19, 32 }
  0x95   :  { %v1157_v20 = vpop.f32.mrf.mxu2 }
  0x96   :  { %v295_v21 = vpop.f32.mrf.mxu0 }
  0x97   :  { %v296_v22 = vadd.f32 %v1148_v13, %v295_v21  ;;  %v1160_v23 = vpop.f32.mrf.mxu1 }
  0x99   :  { %v437_v25 = vmax.f32 %v296_v22, 0.0  ;;  %v400_v22 = vpop.f32.mrf.mxu3 }
  0x9b   :  { %485 = vxpose.xlu0.b32.cont [2/16] (narrow) %v437_v25, 32 }
  0x9d   :  { %v1163_v26 = vpop.f32.mrf.mxu2 }
  0x9e   :  { %v298_v27 = vpop.f32.mrf.mxu0 }
  0x9f   :  { %v299_v28 = vadd.f32 %v1148_v13, %v298_v27  ;;  %v1166_v29 = vpop.f32.mrf.mxu1 }
  0xa1   :  { %v438_v32 = vmax.f32 %v299_v28, 0.0 }
  0xa3   :  { %486 = vxpose.xlu0.b32.cont [3/16] (narrow) %v438_v32, 32 }
  0xa5   :  { %v1172_v33 = vpop.f32.mrf.mxu2 }
  0xa6   :  { %v301_v34 = vpop.f32.mrf.mxu0 }
  0xa7   :  { %v302_v35 = vadd.f32 %v1148_v13, %v301_v34  ;;  %v1175_v36 = vpop.f32.mrf.mxu1 }
  0xa9   :  { %v439_v38 = vmax.f32 %v302_v35, 0.0 }
  0xab   :  { %487 = vxpose.xlu0.b32.cont [4/16] (narrow) %v439_v38, 32  ;;  %v403_v38 = vpop.f32.mrf.mxu3 }
  0xad   :  { %v1178_v39 = vpop.f32.mrf.mxu2 }
  0xae   :  { %v304_v40 = vpop.f32.mrf.mxu0 }
  0xaf   :  { %v305_v41 = vadd.f32 %v1148_v13, %v304_v40  ;;  %v340_v42 = vpop.f32.mrf.mxu1 }
  0xb0   :  { %v341_v43 = vadd.f32 %v1148_v13, %v340_v42 }
  0xb1   :  { %v440_v44 = vmax.f32 %v305_v41, 0.0 }
  0xb2   :  { %v452_v45 = vmax.f32 %v341_v43, 0.0 }
  0xb3   :  { %488 = vxpose.xlu0.b32.cont [5/16] (narrow) %v440_v44, 32 }
  0xb4   :  { %516 = vxpose.xlu1.b32.start [1/16] (narrow) %v452_v45, 32 }
  0xb5   :  { %v1182_v46 = vpop.f32.mrf.mxu2 }
  0xb6   :  { %v307_v47 = vpop.f32.mrf.mxu0 }
  0xb7   :  { %v308_v48 = vadd.f32 %v1148_v13, %v307_v47  ;;  %v343_v49 = vpop.f32.mrf.mxu1 }
  0xb8   :  { %v344_v51 = vadd.f32 %v1148_v13, %v343_v49 }
  0xb9   :  { %v441_v52 = vmax.f32 %v308_v48, 0.0 }
  0xba   :  { %v453_v53 = vmax.f32 %v344_v51, 0.0  ;;  %v329_v51 = vadd.f32 %v1148_v13, %v1151_v16  ;;  %v368_v16 = vadd.f32 %v1148_v13, %v1163_v26 }
  0xbb   :  { %489 = vxpose.xlu0.b32.cont [6/16] (narrow) %v441_v52, 32 }
  0xbc   :  { %517 = vxpose.xlu1.b32.cont [2/16] (narrow) %v453_v53, 32  ;;  %v406_v53 = vpop.f32.mrf.mxu3 }
  0xbd   :  { %v1186_v54 = vpop.f32.mrf.mxu2  ;;  %v407_v26 = vadd.f32 %v1148_v13, %v406_v53 }
  0xbe   :  { %v310_v55 = vpop.f32.mrf.mxu0 }
  0xbf   :  { %v311_v56 = vadd.f32 %v1148_v13, %v310_v55  ;;  %v346_v57 = vpop.f32.mrf.mxu1  ;;  %v365_v55 = vadd.f32 %v1148_v13, %v1157_v20  ;;  %v461_v20 = vmax.f32 %v368_v16, 0.0 }
  0xc0   :  { %v347_v58 = vadd.f32 %v1148_v13, %v346_v57 }
  0xc1   :  { %v442_v59 = vmax.f32 %v311_v56, 0.0 }
  0xc2   :  { %v454_v60 = vmax.f32 %v347_v58, 0.0  ;;  %v448_v58 = vmax.f32 %v329_v51, 0.0  ;;  %v582_v51 = vld [vmem:[%s1269_s3 + $0x10] sm:$0xff] }
  0xc3   :  { %490 = vxpose.xlu0.b32.cont [7/16] (narrow) %v442_v59, 32  ;;  %v460_v59 = vmax.f32 %v365_v55, 0.0  ;;  %v587_v55 = vpop.permute.xlu0 %586 }
  0xc4   :  { %518 = vxpose.xlu1.b32.cont [3/16] (narrow) %v454_v60, 32  ;;  %v401_v60 = vadd.f32 %v1148_v13, %v400_v22 }
  0xc5   :  { %v1190_v61 = vpop.f32.mrf.mxu2 }
  0xc6   :  { %v313_v62 = vpop.f32.mrf.mxu0 }
  0xc7   :  { %v314_v63 = vadd.f32 %v1148_v13, %v313_v62  ;;  %v349_v0 = vpop.f32.mrf.mxu1  ;;  %v332_v62 = vadd.f32 %v1148_v13, %v1160_v23 }
  0xc8   :  { %v350_v1 = vadd.f32 %v1148_v13, %v349_v0  ;;  %v409_v0 = vpop.f32.mrf.mxu3 }
  0xc9   :  { %v443_v2 = vmax.f32 %v314_v63, 0.0  ;;  %v472_v63 = vmax.f32 %v401_v60, 0.0 }
  0xca   :  { %v455_v3 = vmax.f32 %v350_v1, 0.0  ;;  %v449_v1 = vmax.f32 %v332_v62, 0.0 }
  0xcb   :  { %491 = vxpose.xlu0.b32.cont [8/16] (narrow) %v443_v2, 32  ;;  %v404_v2 = vadd.f32 %v1148_v13, %v403_v38 }
  0xcc   :  { %519 = vxpose.xlu1.b32.cont [4/16] (narrow) %v455_v3, 32  ;;  %v335_v3 = vadd.f32 %v1148_v13, %v1166_v29 }
  0xcd   :  { %v1194_v4 = vpop.f32.mrf.mxu2 }
  0xce   :  { %v316_v5 = vpop.f32.mrf.mxu0  ;;  %v450_v23 = vmax.f32 %v335_v3, 0.0 }
  0xcf   :  { %v317_v6 = vadd.f32 %v1148_v13, %v316_v5  ;;  %v352_v7 = vpop.f32.mrf.mxu1  ;;  %v371_v5 = vadd.f32 %v1148_v13, %v1172_v33  ;;  %v410_v33 = vadd.f32 %v1148_v13, %v409_v0 }
  0xd0   :  { %v353_v8 = vadd.f32 %v1148_v13, %v352_v7  ;;  %v412_v7 = vpop.f32.mrf.mxu3 }
  0xd1   :  { %v444_v9 = vmax.f32 %v317_v6, 0.0  ;;  %v473_v6 = vmax.f32 %v404_v2, 0.0 }
  0xd2   :  { %v456_v10 = vmax.f32 %v353_v8, 0.0  ;;  %v462_v8 = vmax.f32 %v371_v5, 0.0 }
  0xd3   :  { %492 = vxpose.xlu0.b32.cont [9/16] (narrow) %v444_v9, 32  ;;  %v338_v9 = vadd.f32 %v1148_v13, %v1175_v36  ;;  %v413_v36 = vadd.f32 %v1148_v13, %v412_v7 }
  0xd4   :  { %520 = vxpose.xlu1.b32.cont [5/16] (narrow) %v456_v10, 32  ;;  %v374_v10 = vadd.f32 %v1148_v13, %v1178_v39  ;;  %v380_v39 = vadd.f32 %v1148_v13, %v1186_v54 }
  0xd5   :  { %v388_v11 = vpop.f32.mrf.mxu2  ;;  %v451_v29 = vmax.f32 %v338_v9, 0.0 }
  0xd6   :  { %v319_v12 = vpop.f32.mrf.mxu0  ;;  %v389_v14 = vadd.f32 %v1148_v13, %v388_v11  ;;  %v474_v11 = vmax.f32 %v407_v26, 0.0  ;;  %v465_v22 = vmax.f32 %v380_v39, 0.0 }
  0xd7   :  { %v320_v15 = vadd.f32 %v1148_v13, %v319_v12  ;;  %v355_v17 = vpop.f32.mrf.mxu1  ;;  %v463_v12 = vmax.f32 %v374_v10, 0.0 }
  0xd8   :  { %v356_v18 = vadd.f32 %v1148_v13, %v355_v17  ;;  %v468_v19 = vmax.f32 %v389_v14, 0.0  ;;  %v415_v14 = vpop.f32.mrf.mxu3  ;;  %v475_v17 = vmax.f32 %v410_v33, 0.0 }
  0xd9   :  { %v445_v21 = vmax.f32 %v320_v15, 0.0  ;;  %v377_v15 = vadd.f32 %v1148_v13, %v1182_v46 }
  0xda   :  { %v457_v24 = vmax.f32 %v356_v18, 0.0  ;;  %548 = vxpose.xlu2.b32.start [1/16] (narrow) %v468_v19, 32 }
  0xdb   :  { %493 = vxpose.xlu0.b32.cont [10/16] (narrow) %v445_v21, 32  ;;  %v464_v18 = vmax.f32 %v377_v15, 0.0  ;;  %v476_v21 = vmax.f32 %v413_v36, 0.0 }
  0xdc   :  { %521 = vxpose.xlu1.b32.cont [6/16] (narrow) %v457_v24, 32  ;;  %v416_v24 = vadd.f32 %v1148_v13, %v415_v14 }
  0xdd   :  { %v391_v25 = vpop.f32.mrf.mxu2 }
  0xde   :  { %v392_v27 = vadd.f32 %v1148_v13, %v391_v25  ;;  %v322_v28 = vpop.f32.mrf.mxu0  ;;  %v383_v25 = vadd.f32 %v1148_v13, %v1190_v61  ;;  %v477_v46 = vmax.f32 %v416_v24, 0.0 }
  0xdf   :  { %v323_v30 = vadd.f32 %v1148_v13, %v322_v28  ;;  %v358_v31 = vpop.f32.mrf.mxu1 }
  0xe0   :  { %v469_v32 = vmax.f32 %v392_v27, 0.0  ;;  %v359_v34 = vadd.f32 %v1148_v13, %v358_v31  ;;  %v418_v19 = vpop.f32.mrf.mxu3  ;;  %v466_v28 = vmax.f32 %v383_v25, 0.0  ;;  %v386_v31 = vadd.f32 %v1148_v13, %v1194_v4 }
  0xe1   :  { %v446_v35 = vmax.f32 %v323_v30, 0.0  ;;  %v419_v30 = vadd.f32 %v1148_v13, %v418_v19 }
  0xe2   :  { %v458_v37 = vmax.f32 %v359_v34, 0.0  ;;  %549 = vxpose.xlu2.b32.cont [2/16] (narrow) %v469_v32, 32  ;;  %v467_v34 = vmax.f32 %v386_v31, 0.0 }
  0xe3   :  { %494 = vxpose.xlu0.b32.cont [11/16] (narrow) %v446_v35, 32  ;;  %v478_v54 = vmax.f32 %v419_v30, 0.0 }
  0xe4   :  { %522 = vxpose.xlu1.b32.cont [7/16] (narrow) %v458_v37, 32 }
  0xe5   :  { %v394_v40 = vpop.f32.mrf.mxu2 }
  0xe6   :  { %v395_v41 = vadd.f32 %v1148_v13, %v394_v40  ;;  %v325_v42 = vpop.f32.mrf.mxu0 }
  0xe7   :  { %v326_v43 = vadd.f32 %v1148_v13, %v325_v42  ;;  %v361_v44 = vpop.f32.mrf.mxu1 }
  0xe8   :  { %v470_v45 = vmax.f32 %v395_v41, 0.0  ;;  %v362_v47 = vadd.f32 %v1148_v13, %v361_v44  ;;  %v421_v27 = vpop.f32.mrf.mxu3 }
  0xe9   :  { %v447_v48 = vmax.f32 %v326_v43, 0.0  ;;  %v422_v35 = vadd.f32 %v1148_v13, %v421_v27 }
  0xea   :  { %v459_v49 = vmax.f32 %v362_v47, 0.0  ;;  %550 = vxpose.xlu2.b32.cont [3/16] (narrow) %v470_v45, 32 }
  0xeb   :  { %495 = vxpose.xlu0.b32.cont [12/16] (narrow) %v447_v48, 32  ;;  %v479_v37 = vmax.f32 %v422_v35, 0.0 }
  0xec   :  { %523 = vxpose.xlu1.b32.cont [8/16] (narrow) %v459_v49, 32  ;;  %v583_v49 = vld [vmem:[%s1269_s3 + $0x18] sm:$0xff] }
  0xed   :  { %v397_v52 = vpop.f32.mrf.mxu2 }
  0xee   :  { %v398_v56 = vadd.f32 %v1148_v13, %v397_v52  ;;  %v592_v52 = vpop.permute.xlu1 %591 }
  0xf0   :  { %v471_v57 = vmax.f32 %v398_v56, 0.0  ;;  %v424_v32 = vpop.f32.mrf.mxu3 }
  0xf1   :  { %v425_v61 = vadd.f32 %v1148_v13, %v424_v32 }
  0xf2   :  { %551 = vxpose.xlu2.b32.cont [4/16] (narrow) %v471_v57, 32 }
  0xf3   :  { %496 = vxpose.xlu0.b32.cont [13/16] (narrow) %v448_v58, 32  ;;  %v480_v40 = vmax.f32 %v425_v61, 0.0 }
  0xf4   :  { %524 = vxpose.xlu1.b32.cont [9/16] (narrow) %v460_v59, 32 }
  0xf8   :  { %v427_v38 = vpop.f32.mrf.mxu3 }
  0xf9   :  { %v428_v41 = vadd.f32 %v1148_v13, %v427_v38  ;;  %v644_v38 = vstv %s1270_s4  ;;  %s972_s4 = smov [#allocation3]  }
  0xfa   :  { %552 = vxpose.xlu2.b32.cont [5/16] (narrow) %v472_v63, 32  ;;  %s725_s14 = sshll.u32 %s972_s4, 4  ;;  %s726_s14 = int_to_ptr.vmem [resolvable:$true] %s725_s14 }
  0xfb   :  { %497 = vxpose.xlu0.b32.cont [14/16] (narrow) %v449_v1, 32  ;;  %v481_v43 = vmax.f32 %v428_v41, 0.0 }
  0xfc   :  { %525 = vxpose.xlu1.b32.cont [10/16] (narrow) %v461_v20, 32 }
 0x100   :  { %v430_v42 = vpop.f32.mrf.mxu3 }
 0x101   :  { %v431_v4 = vadd.f32 %v1148_v13, %v430_v42 }
 0x102   :  { %553 = vxpose.xlu2.b32.cont [6/16] (narrow) %v473_v6, 32 }
 0x103   :  { %498 = vxpose.xlu0.b32.cont [15/16] (narrow) %v450_v23, 32  ;;  %v482_v44 = vmax.f32 %v431_v4, 0.0 }
 0x104   :  { %526 = vxpose.xlu1.b32.cont [11/16] (narrow) %v462_v8, 32 }
 0x108   :  { %v433_v45 = vpop.f32.mrf.mxu3 }
 0x109   :  { %v434_v47 = vadd.f32 %v1148_v13, %v433_v45 }
 0x10a   :  { %554 = vxpose.xlu2.b32.cont [7/16] (narrow) %v474_v11, 32 }
 0x10b   :  { %499 = vxpose.xlu0.b32.end [16/16] (narrow) %v451_v29, 32  ;;  %v483_v48 = vmax.f32 %v434_v47, 0.0 }
 0x10c   :  { %527 = vxpose.xlu1.b32.cont [12/16] (narrow) %v463_v12, 32 }
 0x112   :  { %555 = vxpose.xlu2.b32.cont [8/16] (narrow) %v475_v17, 32 }
 0x114   :  { %528 = vxpose.xlu1.b32.cont [13/16] (narrow) %v464_v18, 32 }
 0x11a   :  { %556 = vxpose.xlu2.b32.cont [9/16] (narrow) %v476_v21, 32 }
 0x11c   :  { %529 = vxpose.xlu1.b32.cont [14/16] (narrow) %v465_v22, 32 }
 0x122   :  { %557 = vxpose.xlu2.b32.cont [10/16] (narrow) %v477_v46, 32 }
 0x124   :  { %530 = vxpose.xlu1.b32.cont [15/16] (narrow) %v466_v28, 32 }
 0x12a   :  { %558 = vxpose.xlu2.b32.cont [11/16] (narrow) %v478_v54, 32 }
 0x12c   :  { %531 = vxpose.xlu1.b32.end [16/16] (narrow) %v467_v34, 32 }
 0x132   :  { %559 = vxpose.xlu2.b32.cont [12/16] (narrow) %v479_v37, 32 }
 0x137   :  { %v500_v13 = vpop.trf.xlu0 }
 0x138   :  { %v604_v1 = vmul.f32 %v587_v55, %v500_v13 }
 0x13a   :  { %560 = vxpose.xlu2.b32.cont [13/16] (narrow) %v480_v40, 32 }
 0x13f   :  { %v501_v60 = vpop.trf.xlu0 }
 0x142   :  { %561 = vxpose.xlu2.b32.cont [14/16] (narrow) %v481_v43, 32 }
 0x147   :  { %v502_v63 = vpop.trf.xlu0 }
 0x14a   :  { %562 = vxpose.xlu2.b32.cont [15/16] (narrow) %v482_v44, 32 }
 0x14f   :  { %v503_v8 = vpop.trf.xlu0 }
 0x152   :  { %563 = vxpose.xlu2.b32.end [16/16] (narrow) %v483_v48, 32 }
 0x158   :  { %v532_v53 = vpop.trf.xlu1 }
 0x159   :  { %v605_v20 = vmul.f32 %v587_v55, %v532_v53 }
 0x160   :  { %v533_v57 = vpop.trf.xlu1 }
 0x161   :  { %v608_v2 = vmul.f32 %v592_v52, %v533_v57 }
 0x163   :  { %v625_v7 = vadd.f32 %v608_v2, %v605_v20 }
 0x168   :  { %v534_v59 = vpop.trf.xlu1 }
 0x170   :  { %v535_v16 = vpop.trf.xlu1 }
 0x173   :  { %v564_v56 = vpop.trf.xlu2 }
 0x174   :  { %v606_v3 = vmul.f32 %v587_v55, %v564_v56 }
 0x17b   :  { %v565_v58 = vpop.trf.xlu2 }
 0x17c   :  { %v609_v5 = vmul.f32 %v592_v52, %v565_v58 }
 0x17e   :  { %v634_v9 = vadd.f32 %v609_v5, %v606_v3 }
 0x183   :  { %v566_v62 = vpop.trf.xlu2 }
 0x186   :  { %601 = vperm.xlu1 %930, %v583_v49  }
 0x18b   :  { %v567_v0 = vpop.trf.xlu2 }
 0x1b4   :  { %931 = vset.pattern.permute.xlu2 %v971_v50  ;;  %v607_v50 = vmul.f32 %v592_v52, %v501_v60 }
 0x1b6   :  { %v616_v23 = vadd.f32 %v607_v50, %v604_v1 }
 0x1bb   :  { %596 = vperm.xlu2 %931, %v582_v51  }
 0x1f8   :  { %v602_v6 = vpop.permute.xlu1 %601 }
 0x1f9   :  { %v614_v12 = vmul.f32 %v602_v6, %v535_v16  ;;  %v615_v33 = vmul.f32 %v602_v6, %v567_v0  ;;  %v613_v14 = vmul.f32 %v602_v6, %v503_v8 }
 0x215   :  { %v597_v26 = vpop.permute.xlu2 %596 }
 0x216   :  { %v610_v10 = vmul.f32 %v597_v26, %v502_v63  ;;  %v611_v11 = vmul.f32 %v597_v26, %v534_v59  ;;  %v612_v29 = vmul.f32 %v597_v26, %v566_v62 }
 0x218   :  { %v617_v15 = vadd.f32 %v616_v23, %v610_v10  ;;  %v626_v17 = vadd.f32 %v625_v7, %v611_v11  ;;  %v635_v18 = vadd.f32 %v634_v9, %v612_v29 }
 0x21a   :  { %v618_v36 = vadd.f32 %v617_v15, %v613_v14  ;;  %v627_v19 = vadd.f32 %v626_v17, %v614_v12  ;;  %v636_v39 = vadd.f32 %v635_v18, %v615_v33  ;;  %v715_v14 = vlaneseq }
 0x21c   :  { %v619_v21 = vrot.slane %v618_v36, 4  ;;  %v628_v22 = vrot.slane %v627_v19, 4  ;;  %v637_v24 = vrot.slane %v636_v39, 4  ;;  %vm717_vm15 = vcmp.lt.s32.totalorder %v715_v14, 384 }
 0x21e   :  { %v620_v25 = vadd.f32 %v619_v21, %v618_v36  ;;  %v629_v46 = vadd.f32 %v628_v22, %v627_v19  ;;  %v638_v27 = vadd.f32 %v637_v24, %v636_v39 }
 0x220   :  { %v621_v28 = vrot.slane %v620_v25, 2  ;;  %v630_v30 = vrot.slane %v629_v46, 2  ;;  %v639_v31 = vrot.slane %v638_v27, 2 }
 0x222   :  { %v622_v54 = vadd.f32 %v621_v28, %v620_v25  ;;  %v631_v32 = vadd.f32 %v630_v30, %v629_v46  ;;  %v640_v34 = vadd.f32 %v639_v31, %v638_v27 }
 0x224   :  { %v623_v35 = vrot.slane %v622_v54, 1  ;;  %v632_v37 = vrot.slane %v631_v32, 1  ;;  %v641_v61 = vrot.slane %v640_v34, 1 }
 0x226   :  { %v624_v40 = vadd.f32 %v623_v35, %v622_v54  ;;  %v633_v41 = vadd.f32 %v632_v37, %v631_v32  ;;  %v642_v42 = vadd.f32 %v641_v61, %v640_v34 }
 0x228   :  { %v645_v43 = vadd.f32 %v644_v38, %v624_v40  ;;  %v646_v4 = vadd.f32 %v644_v38, %v633_v41  ;;  %v647_v44 = vadd.f32 %v644_v38, %v642_v42 }
 0x22a   :  { %v648_v45 = vsub.f32 0.0, %v645_v43  ;;  %v649_v47 = vsub.f32 0.0, %v646_v4  ;;  %v650_v48 = vsub.f32 0.0, %v647_v44 }
 0x22c   :  { %v651_v49 = vmul.f32 1.442695, %v648_v45  ;;  %v653_v51 = vmul.f32 1.442695, %v649_v47  ;;  %v655_v52 = vmul.f32 1.442695, %v650_v48 }
 0x22e   :  { %933 = vpow2.f32 %v651_v49 }
 0x22f   :  { %935 = vpow2.f32 %v653_v51 }
 0x230   :  { %937 = vpow2.f32 %v655_v52 }
 0x234   :  { %v934_v53 = vpop.eup %933 }
 0x235   :  { %v936_v55 = vpop.eup %935  ;;  %v657_v56 = vadd.f32 1.0, %v934_v53 }
 0x236   :  { %v938_v57 = vpop.eup %937  ;;  %v658_v13 = vadd.f32 1.0, %v936_v55 }
 0x237   :  { %v659_v58 = vadd.f32 1.0, %v938_v57  ;;  %939 = vrcp.f32 %v657_v56  ;;  %vm665_vm1 = vweird.f32 %v657_v56  ;;  %v671_v50 = vand.u32 2147483648, %v657_v56 }
 0x238   :  { %941 = vrcp.f32 %v658_v13  ;;  %v686_v3 = vand.u32 2147483648, %v658_v13  ;;  %v684_v23 = vand.u32 2147483647, %v658_v13  ;;  %v669_v11 = vand.u32 2147483647, %v657_v56 }
 0x239   :  { %943 = vrcp.f32 %v659_v58  ;;  %v701_v7 = vand.u32 2147483648, %v659_v58  ;;  %v699_v9 = vand.u32 2147483647, %v659_v58  ;;  %vm680_vm6 = vweird.f32 %v658_v13 }
 0x23a   :  { %v687_v12 = vor.u32 1.1754944e-38, %v686_v3  ;;  %vm695_vm9 = vweird.f32 %v659_v58  ;;  %vm685_vm10 = vcmp.eq.f32.partialorder %v684_v23, 8.507059e+37  ;;  %v672_v36 = vor.u32 1.1754944e-38, %v671_v50 }
 0x23b   :  { %v702_v18 = vor.u32 1.1754944e-38, %v701_v7  ;;  %vm700_vm12 = vcmp.eq.f32.partialorder %v699_v9, 8.507059e+37  ;;  %vm670_vm13 = vcmp.eq.f32.partialorder %v669_v11, 8.507059e+37 }
 0x23d   :  { %v940_v59 = vpop.eup %939 }
 0x23e   :  { %v942_v60 = vpop.eup %941  ;;  %v661_v62 = vmul.f32 %v940_v59, %v657_v56  ;;  %vm666_vm2 = vweird.f32 %v940_v59 }
 0x23f   :  { %v944_v16 = vpop.eup %943  ;;  %v676_v63 = vmul.f32 %v942_v60, %v658_v13  ;;  %vm681_vm3 = vweird.f32 %v942_v60  ;;  %vm1255_vm5 = vmor %vm665_vm1, %vm666_vm2 }
 0x240   :  { %v662_v0 = vsub.f32 1.0, %v661_v62  ;;  %v691_v1 = vmul.f32 %v944_v16, %v659_v58  ;;  %vm696_vm4 = vweird.f32 %v944_v16  ;;  %vm682_vm8 = vmor %vm680_vm6, %vm681_vm3 }
 0x241   :  { %v677_v20 = vsub.f32 1.0, %v676_v63  ;;  %vm697_vm11 = vmor %vm695_vm9, %vm696_vm4 }
 0x242   :  { %v663_v2 = vmul.f32 %v940_v59, %v662_v0  ;;  %v692_v5 = vsub.f32 1.0, %v691_v1 }
 0x243   :  { %v678_v6 = vmul.f32 %v942_v60, %v677_v20 }
 0x244   :  { %v664_v8 = vadd.f32 %v940_v59, %v663_v2  ;;  %v693_v26 = vmul.f32 %v944_v16, %v692_v5 }
 0x245   :  { %v679_v29 = vadd.f32 %v942_v60, %v678_v6 }
 0x246   :  { %v694_v33 = vadd.f32 %v944_v16, %v693_v26  ;;  %v668_v15 = vsel %vm1255_vm5, %v940_v59, %v664_v8 }
 0x247   :  { %v683_v17 = vsel %vm682_vm8, %v942_v60, %v679_v29  ;;  %v673_v24 = vsel %vm670_vm13, %v672_v36, %v668_v15 }
 0x248   :  { %v688_v19 = vsel %vm685_vm10, %v687_v12, %v683_v17  ;;  %v698_v39 = vsel %vm697_vm11, %v944_v16, %v694_v33 }
 0x249   :  { %v703_v21 = vsel %vm700_vm12, %v702_v18, %v698_v39  ;;  %v708_v22 = vrot.slane %v688_v19, 7 }
 0x24a   :  { %v709_v25 = vrot.slane %v703_v21, 6 }
 0x24b   :  { %v711_v46 = vsel %vm710_vm7, %v673_v24, %v708_v22 }
 0x24c   :  { %v713_v27 = vsel %vm712_vm14, %v711_v46, %v709_v25 }
 0x24d   :  { %719 = vst.msk [vmem:[#allocation3] sm:$0x7] %vm717_vm15, %v713_v27 }
 0x24e   :  { %730 = dma.vmem_to_hbm [thread:$0]  %s726_s14, 48, %s728_s16, [#allocation4]  }
 0x24f   :  { %969 = dma.done.wait [#allocation4], 48  }
 0x250   :  { %970 = vsyncadd [#allocation4], 4294967248 }
 0x251   :  { %735 = vsyncpa [#allocation4], 1 }

</bundles_post_ra>
